<compile_context>
chip_gen: v7x
topology: tpu7x:2x2x1
jax: 0.10.0
libtpu: 0.0.40
codegen_flags: <defaults>
</compile_context>

<pallas_src>
import jax
import jax.numpy as jnp
from jax.experimental import pallas as pl
from jax.experimental.pallas import tpu as pltpu

_LANE = 128
_SUBLANE = 8


def _activation_fn(name):
    if name == "relu":
        return lambda h: jnp.maximum(h, 0.0)
    elif name == "gelu":
        # PyTorch nn.GELU default is the exact (erf) formulation.  The tanh
        # approximation (approximate=True) lowers mostly to the EUP and is
        # cheaper, but we keep exact erf for parity with the reference module.
        return lambda h: jax.nn.gelu(h, approximate=False)
    raise ValueError(f"unknown activation {name!r}")


def _round_up(n, m):
    return ((n + m - 1) // m) * m


def _vmem_capacity_bytes():
    """Physical VMEM per TensorCore; conservative 64 MiB (v7x) fallback."""
    try:
        return int(pltpu.get_tpu_info().vmem_capacity_bytes)
    except Exception:
        return 64 << 20


def _replicated_spec(shape, single_buffer):
    """BlockSpec for an operand that is identical at every grid step."""
    index_map = lambda i: (0,) * len(shape)
    if single_buffer and hasattr(pl, "Buffered"):
        try:
            # Constant index_map -> no prefetch needed; single-buffering halves
            # the resident weight footprint.
            return pl.BlockSpec(shape, index_map, pipeline_mode=pl.Buffered(1))
        except TypeError:
            pass
    return pl.BlockSpec(shape, index_map)


def _pick_tile(dim_p, candidates=(512, 256, 128)):
    for c in candidates:
        if dim_p % c == 0:
            return c
    return dim_p


# ---------------------------------------------------------------------------
# Fused path: all weights resident in VMEM, grid over the batch only.
# ---------------------------------------------------------------------------
def _make_mlp_kernel(num_layers, activation, mm_dtype):
    act = _activation_fn(activation)

    def kernel(*refs):
        # refs = (x_ref, w0_ref, b0_ref, w1_ref, b1_ref, ..., out_ref)
        x_ref = refs[0]
        out_ref = refs[-1]

        h = x_ref[...].astype(mm_dtype)                 # MXU operand dtype
        for i in range(num_layers):
            w = refs[1 + 2 * i][...].astype(mm_dtype)   # [D_in_p, D_out_p]
            b = refs[2 + 2 * i][...]                    # [1, D_out_p] f32
            acc = jnp.dot(h, w, preferred_element_type=jnp.float32) + b
            if i < num_layers - 1:
                # Activation in f32, then back to the matmul dtype.
                h = act(acc).astype(mm_dtype)
            else:
                out_ref[...] = acc.astype(out_ref.dtype)

    return kernel


def _mlp_fused(x, params, activation, mm_dtype, dims, dims_p,
               weight_bytes, vmem_ceiling):
    B = x.shape[0]
    num_layers = len(params)
    isz = jnp.dtype(x.dtype).itemsize
    mm_isz = mm_dtype.itemsize

    # --- batch tile: the largest TB that fits alongside the resident weights.
    # Per-row bytes besides weights: double-buffered x and out tiles + widest
    # live activation (matmul dtype) + f32 accumulator + f32 bias broadcast.
    per_row = (2 * dims_p[0] * mm_isz + 2 * dims_p[-1] * isz
               + max(dims_p) * mm_isz + 2 * max(dims_p) * 4)
    slack = 4 << 20
    avail = vmem_ceiling - weight_bytes - slack
    rows = avail // per_row if avail > 0 else _SUBLANE
    tb = int(min(max(rows, _SUBLANE), 1024)) // _SUBLANE * _SUBLANE
    if tb >= 256:
        tb = (tb // 256) * 256          # match the 256-wide MXU on v6e/v7x
    tb = max(tb, _SUBLANE)
    tb = min(tb, _round_up(max(B, _SUBLANE), _SUBLANE))
    if B >= 256:
        # Keep >=2 grid steps so the "parallel" axis can shard across the two
        # v7x TensorCores.
        tb = min(tb, _round_up(pl.cdiv(B, 2), _SUBLANE))
        if tb >= 256:
            tb = (tb // 256) * 256
    b_pad = _round_up(B, tb)

    # --- padded operands (padding is inert: act(0) == 0, zero weights/bias).
    x_p = (jnp.zeros((b_pad, dims_p[0]), mm_dtype)
           .at[:B, :dims[0]].set(x.astype(mm_dtype)))
    flat_inputs = [x_p]
    for li, (w, b) in enumerate(params):
        d_out, d_in = w.shape
        w_t = (jnp.zeros((dims_p[li], dims_p[li + 1]), mm_dtype)
               .at[:d_in, :d_out].set(w.T.astype(mm_dtype)))
        b_p = (jnp.zeros((1, dims_p[li + 1]), jnp.float32)
               .at[0, :d_out].set(b.astype(jnp.float32)))
        flat_inputs += [w_t, b_p]

    kernel = _make_mlp_kernel(num_layers, activation, mm_dtype)

    flops = 2 * b_pad * sum(dims_p[i] * dims_p[i + 1] for i in range(num_layers))
    transcendentals = 0 if activation == "relu" else b_pad * sum(dims_p[1:-1])
    bytes_accessed = sum(int(a.size) * a.dtype.itemsize for a in flat_inputs)
    bytes_accessed += b_pad * dims_p[-1] * isz

    def run(single_buffer_weights):
        in_specs = [pl.BlockSpec((tb, dims_p[0]), lambda i: (i, 0))]
        for li in range(num_layers):
            in_specs.append(_replicated_spec((dims_p[li], dims_p[li + 1]),
                                             single_buffer_weights))
            in_specs.append(_replicated_spec((1, dims_p[li + 1]),
                                             single_buffer_weights))
        wfac = 1 if single_buffer_weights else 2
        vmem_budget = int(min(max(wfac * weight_bytes + tb * per_row + slack,
                                  16 << 20),
                              vmem_ceiling))
        out = pl.pallas_call(
            kernel,
            out_shape=jax.ShapeDtypeStruct((b_pad, dims_p[-1]), x.dtype),
            grid=(b_pad // tb,),
            in_specs=in_specs,
            out_specs=pl.BlockSpec((tb, dims_p[-1]), lambda i: (i, 0)),
            compiler_params=pltpu.CompilerParams(
                dimension_semantics=("parallel",),
                vmem_limit_bytes=vmem_budget,
            ),
            cost_estimate=pl.CostEstimate(
                flops=flops,
                transcendentals=transcendentals,
                bytes_accessed=bytes_accessed,
            ),
        )(*flat_inputs)
        return jax.block_until_ready(out)

    try:
        out = run(True)
    except Exception:
        # pl.Buffered(1) not supported by this jax/Mosaic build -> default
        # (double-buffered) replicated specs.
        out = run(False)

    return out[:B, :dims[-1]]


# ---------------------------------------------------------------------------
# Streamed path: per-layer matmul kernel with K tiled last ("arbitrary"), for
# weight stacks that do not fit VMEM (e.g. v7x 64 MiB per TensorCore).
# ---------------------------------------------------------------------------
def _linear_layer_streamed(x, w, b, activation, apply_act, mm_dtype,
                           vmem_ceiling):
    act = _activation_fn(activation)
    B, D_in = x.shape
    D_out = w.shape[0]
    din_p = _round_up(D_in, _LANE)
    dout_p = _round_up(D_out, _LANE)
    tk = _pick_tile(din_p)
    tn = _pick_tile(dout_p)
    tm = min(512, _round_up(max(B, _SUBLANE), _SUBLANE))
    if tm >= 256:
        tm = (tm // 256) * 256
    b_pad = _round_up(B, tm)

    isz = jnp.dtype(x.dtype).itemsize
    mm_isz = mm_dtype.itemsize

    x_p = (jnp.zeros((b_pad, din_p), mm_dtype)
           .at[:B, :D_in].set(x.astype(mm_dtype)))
    w_t = (jnp.zeros((din_p, dout_p), mm_dtype)
           .at[:D_in, :D_out].set(w.T.astype(mm_dtype)))
    b_p = (jnp.zeros((1, dout_p), jnp.float32)
           .at[0, :D_out].set(b.astype(jnp.float32)))

    def kernel(x_ref, w_ref, b_ref, o_ref, acc_ref):
        k = pl.program_id(2)

        @pl.when(k == 0)
        def _():
            acc_ref[...] = jnp.zeros_like(acc_ref)

        acc_ref[...] += jnp.dot(x_ref[...], w_ref[...],
                                preferred_element_type=jnp.float32)

        @pl.when(k == pl.num_programs(2) - 1)
        def _():
            r = acc_ref[...] + b_ref[...]
            if apply_act:
                r = act(r)
            o_ref[...] = r.astype(o_ref.dtype)

    tile_bytes = (2 * tm * tk * mm_isz + 2 * tk * tn * mm_isz
                  + 2 * tm * tn * isz + tm * tn * 4 + 2 * tn * 4)
    vmem_budget = int(min(max(tile_bytes + (8 << 20), 16 << 20), vmem_ceiling))

    out = pl.pallas_call(
        kernel,
        out_shape=jax.ShapeDtypeStruct((b_pad, dout_p), x.dtype),
        grid=(b_pad // tm, dout_p // tn, din_p // tk),
        in_specs=[pl.BlockSpec((tm, tk), lambda i, j, k: (i, k)),
                  pl.BlockSpec((tk, tn), lambda i, j, k: (k, j)),
                  pl.BlockSpec((1, tn), lambda i, j, k: (0, j))],
        out_specs=pl.BlockSpec((tm, tn), lambda i, j, k: (i, j)),
        scratch_shapes=[pltpu.VMEM((tm, tn), jnp.float32)],
        compiler_params=pltpu.CompilerParams(
            dimension_semantics=("parallel", "parallel", "arbitrary"),
            vmem_limit_bytes=vmem_budget,
        ),
    )(x_p, w_t, b_p)
    return out[:B, :D_out]


def _mlp_streamed(x, params, activation, mm_dtype, vmem_ceiling):
    h = x
    num_layers = len(params)
    for li, (w, b) in enumerate(params):
        h = _linear_layer_streamed(h, w, b, activation,
                                   apply_act=(li < num_layers - 1),
                                   mm_dtype=mm_dtype,
                                   vmem_ceiling=vmem_ceiling)
    return h


# ---------------------------------------------------------------------------
# Public wrapper
# ---------------------------------------------------------------------------
def mlp_pallas(x, params, activation: str = "relu", matmul_dtype=None):
    """x: [B, D_in]; params: list of (weight [D_out, D_in], bias [D_out])
    in PyTorch nn.Linear layout.  Returns [B, D_out_last] in x.dtype.

    matmul_dtype: optional lower-precision MXU operand dtype (e.g.
    jnp.bfloat16) for v6e/v7x throughput; accumulation / bias / activation
    stay in f32.  None keeps the input dtype (bit-faithful to the f32 ref).
    """
    B, D_in = x.shape
    num_layers = len(params)
    dims = [D_in] + [w.shape[0] for w, _ in params]
    dims_p = [_round_up(d, _LANE) for d in dims]

    mm_dtype = (jnp.dtype(matmul_dtype) if matmul_dtype is not None
                else jnp.dtype(x.dtype))
    mm_isz = mm_dtype.itemsize

    vmem_cap = _vmem_capacity_bytes()
    vmem_ceiling = int(0.85 * vmem_cap)   # headroom for Mosaic scratch / sems

    # Padded, single-buffered weight (+ f32 bias) footprint.
    weight_bytes = sum(dims_p[i] * dims_p[i + 1] * mm_isz + dims_p[i + 1] * 4
                       for i in range(num_layers))

    if weight_bytes > int(0.6 * vmem_ceiling):
        # Weight stack cannot stay fully resident: stream per layer.
        return _mlp_streamed(x, params, activation, mm_dtype, vmem_ceiling)

    return _mlp_fused(x, params, activation, mm_dtype, dims, dims_p,
                      weight_bytes, vmem_ceiling)


# ---------------------------------------------------------------------------
# Reference / init / test
# ---------------------------------------------------------------------------
def init_mlp_params(key, dimensions, dtype=jnp.float32):
    """Deterministic init matching nn.Linear shapes: W [out, in], b [out]."""
    params = []
    last_dim = dimensions[0]
    for dim in dimensions[1:]:
        kw, kb, key = jax.random.split(key, 3)
        bound = 1.0 / (last_dim ** 0.5)  # PyTorch default uniform bound
        w = jax.random.uniform(kw, (dim, last_dim), dtype, -bound, bound)
        b = jax.random.uniform(kb, (dim,), dtype, -bound, bound)
        params.append((w, b))
        last_dim = dim
    return params


def mlp_reference(x, params, activation: str = "relu"):
    act = _activation_fn(activation)
    h = x.astype(jnp.float32)
    for i, (w, b) in enumerate(params):
        h = h @ w.T.astype(jnp.float32) + b.astype(jnp.float32)
        if i < len(params) - 1:
            h = act(h)
    return h.astype(x.dtype)


if __name__ == "__main__":
    key = jax.random.PRNGKey(0)
    k_x, k_p = jax.random.split(key)

    batch = 8
    dimensions = [32, 64, 16]   # MLP(dimensions=[32, 64, 16])

    x = jax.random.normal(k_x, (batch, dimensions[0]), jnp.float32)
    params = init_mlp_params(k_p, dimensions)

    ok = True
    for activation in ("relu", "gelu"):
        out = jax.block_until_ready(mlp_pallas(x, params, activation))
        ref = mlp_reference(x, params, activation)
        assert out.shape == (batch, dimensions[-1])
        if not jnp.allclose(out, ref, atol=1e-5, rtol=1e-5):
            ok = False
            print(f"mismatch vs reference for activation={activation}")

    if ok:
        print("KERNEL_OK")
</pallas_src>

<mosaic_0001>
module attributes {stable_mosaic.version = 11 : i64} {
  func.func @kernel(%arg0: i32, %arg1: memref<8x128xf32, #tpu.memory_space<vmem>>, %arg2: memref<128x128xf32, #tpu.memory_space<vmem>>, %arg3: memref<1x128xf32, #tpu.memory_space<vmem>>, %arg4: memref<128x128xf32, #tpu.memory_space<vmem>>, %arg5: memref<1x128xf32, #tpu.memory_space<vmem>>, %arg6: memref<8x128xf32, #tpu.memory_space<vmem>>) attributes {dimension_semantics = [#tpu.dimension_semantics<parallel>], iteration_bounds = array<i64: 1>, scalar_prefetch = 0 : i64, scratch_operands = 0 : i64, tpu.core_type = #tpu.core_type<tc>, window_params = [{transform_indices = @transform_0, window_bounds = array<i64: 8, 128>}, {pipeline_mode = #tpu.pipeline_mode<synchronous>, transform_indices = @transform_1, window_bounds = array<i64: 128, 128>}, {pipeline_mode = #tpu.pipeline_mode<synchronous>, transform_indices = @transform_2, window_bounds = array<i64: 1, 128>}, {pipeline_mode = #tpu.pipeline_mode<synchronous>, transform_indices = @transform_3, window_bounds = array<i64: 128, 128>}, {pipeline_mode = #tpu.pipeline_mode<synchronous>, transform_indices = @transform_4, window_bounds = array<i64: 1, 128>}, {transform_indices = @transform_5, window_bounds = array<i64: 8, 128>}]} {
    %c0 = arith.constant 0 : index
    %c0_0 = arith.constant 0 : index
    %0 = vector.load %arg1[%c0, %c0_0] : memref<8x128xf32, #tpu.memory_space<vmem>>, vector<8x128xf32>
    %c0_1 = arith.constant 0 : index
    %c0_2 = arith.constant 0 : index
    %1 = vector.load %arg2[%c0_1, %c0_2] : memref<128x128xf32, #tpu.memory_space<vmem>>, vector<128x128xf32>
    %c0_3 = arith.constant 0 : index
    %c0_4 = arith.constant 0 : index
    %2 = vector.load %arg3[%c0_3, %c0_4] : memref<1x128xf32, #tpu.memory_space<vmem>>, vector<1x128xf32>
    %cst = arith.constant dense<0.000000e+00> : vector<8x128xf32>
    %3 = tpu.matmul %0, %1, %cst {dimension_numbers = #tpu.dot_dimension_numbers<[1], [0], [0], [1], [0, 0, 1, 1], [], []>} : vector<8x128xf32>, vector<128x128xf32>, vector<8x128xf32> -> vector<8x128xf32>
    %4 = vector.broadcast %2 : vector<1x128xf32> to vector<8x128xf32>
    %5 = arith.addf %3, %4 : vector<8x128xf32>
    %cst_5 = arith.constant 0.000000e+00 : f32
    %6 = vector.broadcast %cst_5 : f32 to vector<8x128xf32>
    %7 = arith.maximumf %5, %6 : vector<8x128xf32>
    %c0_6 = arith.constant 0 : index
    %c0_7 = arith.constant 0 : index
    %8 = vector.load %arg4[%c0_6, %c0_7] : memref<128x128xf32, #tpu.memory_space<vmem>>, vector<128x128xf32>
    %c0_8 = arith.constant 0 : index
    %c0_9 = arith.constant 0 : index
    %9 = vector.load %arg5[%c0_8, %c0_9] : memref<1x128xf32, #tpu.memory_space<vmem>>, vector<1x128xf32>
    %cst_10 = arith.constant dense<0.000000e+00> : vector<8x128xf32>
    %10 = tpu.matmul %7, %8, %cst_10 {dimension_numbers = #tpu.dot_dimension_numbers<[1], [0], [0], [1], [0, 0, 1, 1], [], []>} : vector<8x128xf32>, vector<128x128xf32>, vector<8x128xf32> -> vector<8x128xf32>
    %11 = vector.broadcast %9 : vector<1x128xf32> to vector<8x128xf32>
    %12 = arith.addf %10, %11 : vector<8x128xf32>
    %c0_11 = arith.constant 0 : index
    %c0_12 = arith.constant 0 : index
    %13 = vector.load %arg6[%c0_11, %c0_12] : memref<8x128xf32, #tpu.memory_space<vmem>>, vector<8x128xf32>
    tpu.vector_store %arg6[%c0_11, %c0_12], %12 {strides = array<i32>} : memref<8x128xf32, #tpu.memory_space<vmem>>, vector<8x128xf32>,
    return
  }
  func.func @transform_0(%arg0: i32) -> (i32, i32) {
    %c0_i32 = arith.constant 0 : i32
    %c0_i32_0 = arith.constant 0 : i32
    return %arg0, %c0_i32 : i32, i32
  }
  func.func @transform_1(%arg0: i32) -> (i32, i32) {
    %c0_i32 = arith.constant 0 : i32
    %c0_i32_0 = arith.constant 0 : i32
    %c0_i32_1 = arith.constant 0 : i32
    return %c0_i32, %c0_i32_0 : i32, i32
  }
  func.func @transform_2(%arg0: i32) -> (i32, i32) {
    %c0_i32 = arith.constant 0 : i32
    %c0_i32_0 = arith.constant 0 : i32
    %c0_i32_1 = arith.constant 0 : i32
    return %c0_i32, %c0_i32_0 : i32, i32
  }
  func.func @transform_3(%arg0: i32) -> (i32, i32) {
    %c0_i32 = arith.constant 0 : i32
    %c0_i32_0 = arith.constant 0 : i32
    %c0_i32_1 = arith.constant 0 : i32
    return %c0_i32, %c0_i32_0 : i32, i32
  }
  func.func @transform_4(%arg0: i32) -> (i32, i32) {
    %c0_i32 = arith.constant 0 : i32
    %c0_i32_0 = arith.constant 0 : i32
    %c0_i32_1 = arith.constant 0 : i32
    return %c0_i32, %c0_i32_0 : i32, i32
  }
  func.func @transform_5(%arg0: i32) -> (i32, i32) {
    %c0_i32 = arith.constant 0 : i32
    %c0_i32_0 = arith.constant 0 : i32
    return %arg0, %c0_i32 : i32, i32
  }
}

module attributes {stable_mosaic.version = 11 : i64} {
  func.func @kernel(%arg0: i32, %arg1: memref<8x128xf32, #tpu.memory_space<vmem>>, %arg2: memref<128x128xf32, #tpu.memory_space<vmem>>, %arg3: memref<1x128xf32, #tpu.memory_space<vmem>>, %arg4: memref<128x128xf32, #tpu.memory_space<vmem>>, %arg5: memref<1x128xf32, #tpu.memory_space<vmem>>, %arg6: memref<8x128xf32, #tpu.memory_space<vmem>>) attributes {dimension_semantics = [#tpu.dimension_semantics<parallel>], iteration_bounds = array<i64: 1>, scalar_prefetch = 0 : i64, scratch_operands = 0 : i64, tpu.core_type = #tpu.core_type<tc>, window_params = [{transform_indices = @transform_0, window_bounds = array<i64: 8, 128>}, {pipeline_mode = #tpu.pipeline_mode<synchronous>, transform_indices = @transform_1, window_bounds = array<i64: 128, 128>}, {pipeline_mode = #tpu.pipeline_mode<synchronous>, transform_indices = @transform_2, window_bounds = array<i64: 1, 128>}, {pipeline_mode = #tpu.pipeline_mode<synchronous>, transform_indices = @transform_3, window_bounds = array<i64: 128, 128>}, {pipeline_mode = #tpu.pipeline_mode<synchronous>, transform_indices = @transform_4, window_bounds = array<i64: 1, 128>}, {transform_indices = @transform_5, window_bounds = array<i64: 8, 128>}]} {
    %c0 = arith.constant 0 : index
    %c0_0 = arith.constant 0 : index
    %0 = vector.load %arg1[%c0, %c0_0] : memref<8x128xf32, #tpu.memory_space<vmem>>, vector<8x128xf32>
    %c0_1 = arith.constant 0 : index
    %c0_2 = arith.constant 0 : index
    %1 = vector.load %arg2[%c0_1, %c0_2] : memref<128x128xf32, #tpu.memory_space<vmem>>, vector<128x128xf32>
    %c0_3 = arith.constant 0 : index
    %c0_4 = arith.constant 0 : index
    %2 = vector.load %arg3[%c0_3, %c0_4] : memref<1x128xf32, #tpu.memory_space<vmem>>, vector<1x128xf32>
    %cst = arith.constant dense<0.000000e+00> : vector<8x128xf32>
    %3 = tpu.matmul %0, %1, %cst {dimension_numbers = #tpu.dot_dimension_numbers<[1], [0], [0], [1], [0, 0, 1, 1], [], []>} : vector<8x128xf32>, vector<128x128xf32>, vector<8x128xf32> -> vector<8x128xf32>
    %4 = vector.broadcast %2 : vector<1x128xf32> to vector<8x128xf32>
    %5 = arith.addf %3, %4 : vector<8x128xf32>
    %cst_5 = arith.constant 0.000000e+00 : f32
    %6 = vector.broadcast %cst_5 : f32 to vector<8x128xf32>
    %7 = arith.maximumf %5, %6 : vector<8x128xf32>
    %c0_6 = arith.constant 0 : index
    %c0_7 = arith.constant 0 : index
    %8 = vector.load %arg4[%c0_6, %c0_7] : memref<128x128xf32, #tpu.memory_space<vmem>>, vector<128x128xf32>
    %c0_8 = arith.constant 0 : index
    %c0_9 = arith.constant 0 : index
    %9 = vector.load %arg5[%c0_8, %c0_9] : memref<1x128xf32, #tpu.memory_space<vmem>>, vector<1x128xf32>
    %cst_10 = arith.constant dense<0.000000e+00> : vector<8x128xf32>
    %10 = tpu.matmul %7, %8, %cst_10 {dimension_numbers = #tpu.dot_dimension_numbers<[1], [0], [0], [1], [0, 0, 1, 1], [], []>} : vector<8x128xf32>, vector<128x128xf32>, vector<8x128xf32> -> vector<8x128xf32>
    %11 = vector.broadcast %9 : vector<1x128xf32> to vector<8x128xf32>
    %12 = arith.addf %10, %11 : vector<8x128xf32>
    %c0_11 = arith.constant 0 : index
    %c0_12 = arith.constant 0 : index
    %13 = vector.load %arg6[%c0_11, %c0_12] : memref<8x128xf32, #tpu.memory_space<vmem>>, vector<8x128xf32>
    tpu.vector_store %arg6[%c0_11, %c0_12], %12 {strides = array<i32>} : memref<8x128xf32, #tpu.memory_space<vmem>>, vector<8x128xf32>,
    return
  }
  func.func @transform_0(%arg0: i32) -> (i32, i32) {
    %c0_i32 = arith.constant 0 : i32
    %c0_i32_0 = arith.constant 0 : i32
    return %arg0, %c0_i32 : i32, i32
  }
  func.func @transform_1(%arg0: i32) -> (i32, i32) {
    %c0_i32 = arith.constant 0 : i32
    %c0_i32_0 = arith.constant 0 : i32
    %c0_i32_1 = arith.constant 0 : i32
    return %c0_i32, %c0_i32_0 : i32, i32
  }
  func.func @transform_2(%arg0: i32) -> (i32, i32) {
    %c0_i32 = arith.constant 0 : i32
    %c0_i32_0 = arith.constant 0 : i32
    %c0_i32_1 = arith.constant 0 : i32
    return %c0_i32, %c0_i32_0 : i32, i32
  }
  func.func @transform_3(%arg0: i32) -> (i32, i32) {
    %c0_i32 = arith.constant 0 : i32
    %c0_i32_0 = arith.constant 0 : i32
    %c0_i32_1 = arith.constant 0 : i32
    return %c0_i32, %c0_i32_0 : i32, i32
  }
  func.func @transform_4(%arg0: i32) -> (i32, i32) {
    %c0_i32 = arith.constant 0 : i32
    %c0_i32_0 = arith.constant 0 : i32
    %c0_i32_1 = arith.constant 0 : i32
    return %c0_i32, %c0_i32_0 : i32, i32
  }
  func.func @transform_5(%arg0: i32) -> (i32, i32) {
    %c0_i32 = arith.constant 0 : i32
    %c0_i32_0 = arith.constant 0 : i32
    return %arg0, %c0_i32 : i32, i32
  }
}

</mosaic_0001>

<bundles_post_ra>
// kernel: tpu_custom_call.1
= control target key start
LH: loop header
LB: loop body
LE: loop exit
PB: predicated region body
PF: predicated region fallthrough
CT: control target
= control target key end

     0   :  { %10 = vsyncpa [#allocation3], 0  ;;  %s637_s0 = inlined_call_operand.hbm [shape: f32[8,128], index: 0, kind: input, shape index: {}]   ;;  %s638_s1 = inlined_call_operand.hbm [shape: f32[128,128], index: 1, kind: input, shape index: {}]   ;;  %s639_s2 = inlined_call_operand.vmem [shape: f32[1,128], index: 2, kind: input, shape index: {}]   ;;  %s640_s3 = inlined_call_operand.hbm [shape: f32[128,128], index: 3, kind: input, shape index: {}]   ;;  %s641_s4 = inlined_call_operand.vmem [shape: f32[1,128], index: 4, kind: input, shape index: {}]   ;;  %s642_s5 = inlined_call_operand.hbm [shape: f32[8,128], index: 5, kind: output, shape index: {}]  }
   0x1   :  { %11 = vsyncpa [#allocation6], 0 }
   0x2   :  { %12 = vsyncpa [#allocation4], 0  ;;  %s522_s18 = smov [#allocation5]   ;;  %s428_s22 = scalar_lea.hbm %s638_s1, 2048 }
   0x3   :  { %s28_s19 = sshll.u32 %s522_s18, 4  ;;  %p429_p0 = scmp.ne.s32.totalorder %s638_s1, %s428_s22  ;;  %s29_s19 = int_to_ptr.vmem [resolvable:$true] %s28_s19 }
   0x4   :  { %p432_p1 = scmp.lt.u32.totalorder %s428_s22, %s638_s1 }
   0x6   :  { %p434_p2 = pnand %p432_p1, %p429_p0 }
   0x8   :  { %437 = shalt.err (!%p434_p2)
}
   0x9   :  { %s438_s27 = scalar_lea.vmem %s29_s19, 2048  ;;  %p443_p4 = scmp.lt.s32.totalorder %s29_s19, %s29_s19 }
   0xa   :  { %p439_p3 = scmp.ne.s32.totalorder %s29_s19, %s438_s27  ;;  %p444_p5 = scmp.lt.s32.totalorder %s438_s27, %s438_s27 }
   0xc   :  { %p445_p6 = por %p444_p5, %p443_p4 }
   0xe   :  { %p446_p7 = pnand %p445_p6, %p439_p3 }
  0x10   :  { %449 = shalt.err (!%p446_p7)
}
  0x11   :  { %s523_s28 = smov 128   ;;  %s524_s29 = smov 8  }
  0x12   :  { %34 = dma.hbm_to_vmem [thread:$0]  %s638_s1, 2048, %s29_s19, [#allocation6], %s523_s28, %s523_s28, %s524_s29  }
  0x13   :  { %s525_s7 = smov [#allocation2]   ;;  %s526_s9 = smov [#allocation7]  }
  0x14   :  { %s19_s8 = sshll.u32 %s525_s7, 4  ;;  %s42_s10 = sshll.u32 %s526_s9, 4  ;;  %s20_s8 = int_to_ptr.vmem [resolvable:$true] %s19_s8  ;;  %s43_s10 = int_to_ptr.vmem [resolvable:$true] %s42_s10 }
  0x15   :  { %s450_s13 = scalar_lea.hbm %s637_s0, 128 }
  0x16   :  { %p451_p8 = scmp.ne.s32.totalorder %s637_s0, %s450_s13  ;;  %p454_p9 = scmp.lt.u32.totalorder %s450_s13, %s637_s0 }
  0x18   :  { %p456_p10 = pnand %p454_p9, %p451_p8 }
  0x1a   :  { %459 = shalt.err (!%p456_p10)
}
  0x1b   :  { %s460_s1 = scalar_lea.vmem %s20_s8, 128  ;;  %p465_p12 = scmp.lt.s32.totalorder %s20_s8, %s20_s8 }
  0x1c   :  { %p461_p11 = scmp.ne.s32.totalorder %s20_s8, %s460_s1  ;;  %p466_p13 = scmp.lt.s32.totalorder %s460_s1, %s460_s1 }
  0x1e   :  { %p467_p0 = por %p466_p13, %p465_p12 }
  0x20   :  { %p468_p1 = pnand %p467_p0, %p461_p11 }
  0x22   :  { %471 = shalt.err (!%p468_p1)
}
  0x23   :  { %22 = dma.hbm_to_vmem [thread:$0]  %s637_s0, 128, %s20_s8, [#allocation3]  }
  0x24   :  { %s472_s22 = scalar_lea.hbm %s640_s3, 2048 }
  0x25   :  { %p473_p2 = scmp.ne.s32.totalorder %s640_s3, %s472_s22  ;;  %p476_p3 = scmp.lt.u32.totalorder %s472_s22, %s640_s3 }
  0x27   :  { %p478_p4 = pnand %p476_p3, %p473_p2 }
  0x29   :  { %481 = shalt.err (!%p478_p4)
}
  0x2a   :  { %s482_s27 = scalar_lea.vmem %s43_s10, 2048  ;;  %p487_p6 = scmp.lt.s32.totalorder %s43_s10, %s43_s10 }
  0x2b   :  { %p483_p5 = scmp.ne.s32.totalorder %s43_s10, %s482_s27  ;;  %p488_p7 = scmp.lt.s32.totalorder %s482_s27, %s482_s27 }
  0x2d   :  { %p489_p8 = por %p488_p7, %p487_p6 }
  0x2f   :  { %p490_p9 = pnand %p489_p8, %p483_p5 }
  0x31   :  { %493 = shalt.err (!%p490_p9)
}
  0x32   :  { %48 = dma.hbm_to_vmem [thread:$0]  %s640_s3, 2048, %s43_s10, [#allocation6], %s523_s28, %s523_s28, %s524_s29  }
  0x33   :  { %516 = dma.done.wait [#allocation3], 128  }
  0x34   :  { %517 = vsyncadd [#allocation3], 4294967168 }
  0x35   :  { %518 = dma.done.wait [#allocation6], 4096  }
  0x36   :  { %519 = vsyncadd [#allocation6], 4294963200  ;;  %v527_v0 = vmov 0.0|0.0   ;;  %vm528_vm0 = vmmov 0   ;;  %v529_v1 = vmov 0.0   ;;  %v61_v2 = vld [vmem:[#allocation5] sm:$0xff] }
  0x37   :  { %371 = vmatprep.subr.bf16.mxu0 %v527_v0  ;;  %333 = vmatprep.mubr.msk.f32.mxu0 %vm528_vm0, %v529_v1  ;;  %v62_v3 = vld [vmem:[#allocation5 + $0x8] sm:$0xff]  ;;  %v63_v4 = vld [vmem:[#allocation5 + $0x10] sm:$0xff]  ;;  %v64_v6 = vld [vmem:[#allocation5 + $0x18] sm:$0xff]  ;;  %s530_s7 = smov [#allocation8]  }
  0x38   :  { %395 = vmatprep.subr.bf16.mxu1 %v527_v0  ;;  %368 = vmatprep.mubr.msk.f32.mxu1 %vm528_vm0, %v529_v1  ;;  %v372_v5 = vpack.c.bf16 %v62_v3, %v61_v2  ;;  %v375_v7 = vpack.c.bf16 %v64_v6, %v63_v4  ;;  %v65_v8 = vld [vmem:[#allocation5 + $0x20] sm:$0xff]  ;;  %v66_v9 = vld [vmem:[#allocation5 + $0x28] sm:$0xff]  ;;  %v157_v12 = vld [vmem:[#allocation7 + $0x10] sm:$0xff]  ;;  %s255_s8 = sshll.u32 %s530_s7, 4  ;;  %s256_s8 = int_to_ptr.vmem [resolvable:$true] %s255_s8 }
  0x39   :  { %v155_v10 = vld [vmem:[#allocation7] sm:$0xff]  ;;  %v156_v11 = vld [vmem:[#allocation7 + $0x8] sm:$0xff]  ;;  %v158_v13 = vld [vmem:[#allocation7 + $0x18] sm:$0xff]  ;;  %v378_v14 = vpack.c.bf16 %v66_v9, %v65_v8  ;;  %s494_s9 = scalar_lea.vmem %s256_s8, 128  ;;  %p499_p11 = scmp.lt.s32.totalorder %s256_s8, %s256_s8 }
  0x3a   :  { %373 = vmatpush3.bf16.msra.mxu0 %v372_v5  ;;  %v396_v15 = vpack.c.bf16 %v156_v11, %v155_v10  ;;  %v67_v16 = vld [vmem:[#allocation5 + $0x30] sm:$0xff]  ;;  %v68_v17 = vld [vmem:[#allocation5 + $0x38] sm:$0xff]  ;;  %v399_v18 = vpack.c.bf16 %v158_v13, %v157_v12  ;;  %v159_v19 = vld [vmem:[#allocation7 + $0x20] sm:$0xff]  ;;  %p495_p10 = scmp.ne.s32.totalorder %s256_s8, %s494_s9  ;;  %p500_p12 = scmp.lt.s32.totalorder %s494_s9, %s494_s9 }
  0x3b   :  { %374 = vmatprep.subr.bf16.mxu0 %v527_v0  ;;  %v160_v20 = vld [vmem:[#allocation7 + $0x28] sm:$0xff]  ;;  %v381_v21 = vpack.c.bf16 %v68_v17, %v67_v16  ;;  %v69_v22 = vld [vmem:[#allocation5 + $0x40] sm:$0xff]  ;;  %v161_v25 = vld [vmem:[#allocation7 + $0x30] sm:$0xff] }
  0x3c   :  { %397 = vmatpush3.bf16.msra.mxu1 %v396_v15  ;;  %v70_v23 = vld [vmem:[#allocation5 + $0x48] sm:$0xff]  ;;  %v402_v24 = vpack.c.bf16 %v160_v20, %v159_v19  ;;  %v162_v26 = vld [vmem:[#allocation7 + $0x38] sm:$0xff]  ;;  %v71_v28 = vld [vmem:[#allocation5 + $0x50] sm:$0xff]  ;;  %p501_p13 = por %p500_p12, %p499_p11 }
  0x3d   :  { %398 = vmatprep.subr.bf16.mxu1 %v527_v0  ;;  %v384_v27 = vpack.c.bf16 %v70_v23, %v69_v22  ;;  %v72_v29 = vld [vmem:[#allocation5 + $0x58] sm:$0xff]  ;;  %v405_v30 = vpack.c.bf16 %v162_v26, %v161_v25  ;;  %v163_v31 = vld [vmem:[#allocation7 + $0x40] sm:$0xff]  ;;  %v164_v32 = vld [vmem:[#allocation7 + $0x48] sm:$0xff] }
  0x3e   :  { %376 = vmatpush3.bf16.msra.mxu0 %v375_v7  ;;  %v387_v33 = vpack.c.bf16 %v72_v29, %v71_v28  ;;  %v73_v34 = vld [vmem:[#allocation5 + $0x60] sm:$0xff]  ;;  %v74_v35 = vld [vmem:[#allocation5 + $0x68] sm:$0xff]  ;;  %v408_v36 = vpack.c.bf16 %v164_v32, %v163_v31  ;;  %v165_v37 = vld [vmem:[#allocation7 + $0x50] sm:$0xff]  ;;  %p502_p0 = pnand %p501_p13, %p495_p10 }
  0x3f   :  { %377 = vmatprep.subr.bf16.mxu0 %v527_v0  ;;  %v166_v38 = vld [vmem:[#allocation7 + $0x58] sm:$0xff]  ;;  %v390_v39 = vpack.c.bf16 %v74_v35, %v73_v34  ;;  %v75_v40 = vld [vmem:[#allocation5 + $0x70] sm:$0xff]  ;;  %v167_v43 = vld [vmem:[#allocation7 + $0x60] sm:$0xff] }
  0x40   :  { %400 = vmatpush3.bf16.msra.mxu1 %v399_v18  ;;  %v76_v41 = vld [vmem:[#allocation5 + $0x78] sm:$0xff]  ;;  %v411_v42 = vpack.c.bf16 %v166_v38, %v165_v37  ;;  %v168_v44 = vld [vmem:[#allocation7 + $0x68] sm:$0xff]  ;;  %v169_v48 = vld [vmem:[#allocation7 + $0x70] sm:$0xff] }
  0x41   :  { %401 = vmatprep.subr.bf16.mxu1 %v527_v0  ;;  %v393_v45 = vpack.c.bf16 %v76_v41, %v75_v40  ;;  %v414_v46 = vpack.c.bf16 %v168_v44, %v167_v43  ;;  %v60_v47 = vld [vmem:[#allocation2] sm:$0xff] }
  0x42   :  { %379 = vmatpush3.bf16.msra.mxu0 %v378_v14  ;;  %v170_v49 = vld [vmem:[#allocation7 + $0x78] sm:$0xff] }
  0x43   :  { %380 = vmatprep.subr.bf16.mxu0 %v527_v0  ;;  %v417_v50 = vpack.c.bf16 %v170_v49, %v169_v48  ;;  %v265_v51 = vld [vmem:[%s639_s2] ss:$0 sm:$0xff] }
  0x44   :  { %403 = vmatpush3.bf16.msra.mxu1 %v402_v24  ;;  %v266_v56 = vld [vmem:[%s641_s4] ss:$0 sm:$0xff] }
  0x45   :  { %404 = vmatprep.subr.bf16.mxu1 %v527_v0 }
  0x46   :  { %382 = vmatpush3.bf16.msra.mxu0 %v381_v21 }
  0x47   :  { %383 = vmatprep.subr.bf16.mxu0 %v527_v0 }
  0x48   :  { %406 = vmatpush3.bf16.msra.mxu1 %v405_v30 }
  0x49   :  { %407 = vmatprep.subr.bf16.mxu1 %v527_v0 }
  0x4a   :  { %385 = vmatpush3.bf16.msra.mxu0 %v384_v27 }
  0x4b   :  { %386 = vmatprep.subr.bf16.mxu0 %v527_v0 }
  0x4c   :  { %409 = vmatpush3.bf16.msra.mxu1 %v408_v36 }
  0x4d   :  { %410 = vmatprep.subr.bf16.mxu1 %v527_v0 }
  0x4e   :  { %388 = vmatpush3.bf16.msra.mxu0 %v387_v33 }
  0x4f   :  { %389 = vmatprep.subr.bf16.mxu0 %v527_v0 }
  0x50   :  { %412 = vmatpush3.bf16.msra.mxu1 %v411_v42 }
  0x51   :  { %413 = vmatprep.subr.bf16.mxu1 %v527_v0 }
  0x52   :  { %391 = vmatpush3.bf16.msra.mxu0 %v390_v39 }
  0x53   :  { %392 = vmatprep.subr.bf16.mxu0 %v527_v0 }
  0x54   :  { %415 = vmatpush3.bf16.msra.mxu1 %v414_v46 }
  0x55   :  { %416 = vmatprep.subr.bf16.mxu1 %v527_v0 }
  0x56   :  { %394 = vmatpush3.bf16.msra.mxu0 %v393_v45 }
  0x58   :  { %418 = vmatpush3.bf16.msra.mxu1 %v417_v50 }
  0x59   :  { %334 = vmatmul.mubr.f32.vlgmr.msra.gmra.mrb[0].mxu0 %v60_v47 }
 0x12c   :  { %v150_v52 = vpop.f32.mrb[0].mxu0 }
 0x12d   :  { %v151_v53 = vadd.f32 %v265_v51, %v150_v52  ;;  %v335_v54 = vpop.f32.mrb[1].mxu0 }
 0x12f   :  { %v154_v55 = vmax.f32 %v151_v53, 0.0 }
 0x131   :  { %369 = vmatmul.mubr.f32.vlgmr.msra.gmra.mrb[0].mxu1 %v154_v55 }
 0x204   :  { %v244_v57 = vpop.f32.mrb[0].mxu1 }
 0x205   :  { %v245_v58 = vadd.f32 %v266_v56, %v244_v57  ;;  %v370_v59 = vpop.f32.mrb[1].mxu1 }
 0x207   :  { %248 = vst [vmem:[#allocation8] sm:$0xff] %v245_v58 }
 0x208   :  { %505 = shalt.err (!%p502_p0)
}
 0x209   :  { %s506_s11 = scalar_lea.hbm %s642_s5, 128 }
 0x20a   :  { %p507_p1 = scmp.ne.s32.totalorder %s642_s5, %s506_s11  ;;  %p510_p2 = scmp.lt.u32.totalorder %s506_s11, %s642_s5 }
 0x20c   :  { %p512_p3 = pnand %p510_p2, %p507_p1 }
 0x20e   :  { %515 = shalt.err (!%p512_p3)
}
 0x20f   :  { %258 = dma.vmem_to_hbm [thread:$0]  %s256_s8, 128, %s642_s5, [#allocation4]  }
 0x210   :  { %520 = dma.done.wait [#allocation4], 128  }
 0x211   :  { %521 = vsyncadd [#allocation4], 4294967168 }
 0x212   :  { %262 = vsyncpa [#allocation3], 1 }
 0x213   :  { %263 = vsyncpa [#allocation6], 1 }
 0x214   :  { %264 = vsyncpa [#allocation4], 1 }

// kernel: tpu_custom_call.1
= control target key start
LH: loop header
LB: loop body
LE: loop exit
PB: predicated region body
PF: predicated region fallthrough
CT: control target
= control target key end

     0   :  { %10 = vsyncpa [#allocation3], 0  ;;  %s637_s0 = inlined_call_operand.hbm [shape: f32[8,128], index: 0, kind: input, shape index: {}]   ;;  %s638_s1 = inlined_call_operand.hbm [shape: f32[128,128], index: 1, kind: input, shape index: {}]   ;;  %s639_s2 = inlined_call_operand.vmem [shape: f32[1,128], index: 2, kind: input, shape index: {}]   ;;  %s640_s3 = inlined_call_operand.hbm [shape: f32[128,128], index: 3, kind: input, shape index: {}]   ;;  %s641_s4 = inlined_call_operand.vmem [shape: f32[1,128], index: 4, kind: input, shape index: {}]   ;;  %s642_s5 = inlined_call_operand.hbm [shape: f32[8,128], index: 5, kind: output, shape index: {}]  }
   0x1   :  { %11 = vsyncpa [#allocation6], 0 }
   0x2   :  { %12 = vsyncpa [#allocation4], 0  ;;  %s522_s18 = smov [#allocation5]   ;;  %s428_s22 = scalar_lea.hbm %s638_s1, 2048 }
   0x3   :  { %s28_s19 = sshll.u32 %s522_s18, 4  ;;  %p429_p0 = scmp.ne.s32.totalorder %s638_s1, %s428_s22  ;;  %s29_s19 = int_to_ptr.vmem [resolvable:$true] %s28_s19 }
   0x4   :  { %p432_p1 = scmp.lt.u32.totalorder %s428_s22, %s638_s1 }
   0x6   :  { %p434_p2 = pnand %p432_p1, %p429_p0 }
   0x8   :  { %437 = shalt.err (!%p434_p2)
}
   0x9   :  { %s438_s27 = scalar_lea.vmem %s29_s19, 2048  ;;  %p443_p4 = scmp.lt.s32.totalorder %s29_s19, %s29_s19 }
   0xa   :  { %p439_p3 = scmp.ne.s32.totalorder %s29_s19, %s438_s27  ;;  %p444_p5 = scmp.lt.s32.totalorder %s438_s27, %s438_s27 }
   0xc   :  { %p445_p6 = por %p444_p5, %p443_p4 }
   0xe   :  { %p446_p7 = pnand %p445_p6, %p439_p3 }
  0x10   :  { %449 = shalt.err (!%p446_p7)
}
  0x11   :  { %s523_s28 = smov 128   ;;  %s524_s29 = smov 8  }
  0x12   :  { %34 = dma.hbm_to_vmem [thread:$0]  %s638_s1, 2048, %s29_s19, [#allocation6], %s523_s28, %s523_s28, %s524_s29  }
  0x13   :  { %s525_s7 = smov [#allocation2]   ;;  %s526_s9 = smov [#allocation7]  }
  0x14   :  { %s19_s8 = sshll.u32 %s525_s7, 4  ;;  %s42_s10 = sshll.u32 %s526_s9, 4  ;;  %s20_s8 = int_to_ptr.vmem [resolvable:$true] %s19_s8  ;;  %s43_s10 = int_to_ptr.vmem [resolvable:$true] %s42_s10 }
  0x15   :  { %s450_s13 = scalar_lea.hbm %s637_s0, 128 }
  0x16   :  { %p451_p8 = scmp.ne.s32.totalorder %s637_s0, %s450_s13  ;;  %p454_p9 = scmp.lt.u32.totalorder %s450_s13, %s637_s0 }
  0x18   :  { %p456_p10 = pnand %p454_p9, %p451_p8 }
  0x1a   :  { %459 = shalt.err (!%p456_p10)
}
  0x1b   :  { %s460_s1 = scalar_lea.vmem %s20_s8, 128  ;;  %p465_p12 = scmp.lt.s32.totalorder %s20_s8, %s20_s8 }
  0x1c   :  { %p461_p11 = scmp.ne.s32.totalorder %s20_s8, %s460_s1  ;;  %p466_p13 = scmp.lt.s32.totalorder %s460_s1, %s460_s1 }
  0x1e   :  { %p467_p0 = por %p466_p13, %p465_p12 }
  0x20   :  { %p468_p1 = pnand %p467_p0, %p461_p11 }
  0x22   :  { %471 = shalt.err (!%p468_p1)
}
  0x23   :  { %22 = dma.hbm_to_vmem [thread:$0]  %s637_s0, 128, %s20_s8, [#allocation3]  }
  0x24   :  { %s472_s22 = scalar_lea.hbm %s640_s3, 2048 }
  0x25   :  { %p473_p2 = scmp.ne.s32.totalorder %s640_s3, %s472_s22  ;;  %p476_p3 = scmp.lt.u32.totalorder %s472_s22, %s640_s3 }
  0x27   :  { %p478_p4 = pnand %p476_p3, %p473_p2 }
  0x29   :  { %481 = shalt.err (!%p478_p4)
}
  0x2a   :  { %s482_s27 = scalar_lea.vmem %s43_s10, 2048  ;;  %p487_p6 = scmp.lt.s32.totalorder %s43_s10, %s43_s10 }
  0x2b   :  { %p483_p5 = scmp.ne.s32.totalorder %s43_s10, %s482_s27  ;;  %p488_p7 = scmp.lt.s32.totalorder %s482_s27, %s482_s27 }
  0x2d   :  { %p489_p8 = por %p488_p7, %p487_p6 }
  0x2f   :  { %p490_p9 = pnand %p489_p8, %p483_p5 }
  0x31   :  { %493 = shalt.err (!%p490_p9)
}
  0x32   :  { %48 = dma.hbm_to_vmem [thread:$0]  %s640_s3, 2048, %s43_s10, [#allocation6], %s523_s28, %s523_s28, %s524_s29  }
  0x33   :  { %516 = dma.done.wait [#allocation3], 128  }
  0x34   :  { %517 = vsyncadd [#allocation3], 4294967168 }
  0x35   :  { %518 = dma.done.wait [#allocation6], 4096  }
  0x36   :  { %519 = vsyncadd [#allocation6], 4294963200  ;;  %v527_v0 = vmov 0.0|0.0   ;;  %vm528_vm0 = vmmov 0   ;;  %v529_v1 = vmov 0.0   ;;  %v61_v2 = vld [vmem:[#allocation5] sm:$0xff] }
  0x37   :  { %371 = vmatprep.subr.bf16.mxu0 %v527_v0  ;;  %333 = vmatprep.mubr.msk.f32.mxu0 %vm528_vm0, %v529_v1  ;;  %v62_v3 = vld [vmem:[#allocation5 + $0x8] sm:$0xff]  ;;  %v63_v4 = vld [vmem:[#allocation5 + $0x10] sm:$0xff]  ;;  %v64_v6 = vld [vmem:[#allocation5 + $0x18] sm:$0xff]  ;;  %s530_s7 = smov [#allocation8]  }
  0x38   :  { %395 = vmatprep.subr.bf16.mxu1 %v527_v0  ;;  %368 = vmatprep.mubr.msk.f32.mxu1 %vm528_vm0, %v529_v1  ;;  %v372_v5 = vpack.c.bf16 %v62_v3, %v61_v2  ;;  %v375_v7 = vpack.c.bf16 %v64_v6, %v63_v4  ;;  %v65_v8 = vld [vmem:[#allocation5 + $0x20] sm:$0xff]  ;;  %v66_v9 = vld [vmem:[#allocation5 + $0x28] sm:$0xff]  ;;  %v157_v12 = vld [vmem:[#allocation7 + $0x10] sm:$0xff]  ;;  %s255_s8 = sshll.u32 %s530_s7, 4  ;;  %s256_s8 = int_to_ptr.vmem [resolvable:$true] %s255_s8 }
  0x39   :  { %v155_v10 = vld [vmem:[#allocation7] sm:$0xff]  ;;  %v156_v11 = vld [vmem:[#allocation7 + $0x8] sm:$0xff]  ;;  %v158_v13 = vld [vmem:[#allocation7 + $0x18] sm:$0xff]  ;;  %v378_v14 = vpack.c.bf16 %v66_v9, %v65_v8  ;;  %s494_s9 = scalar_lea.vmem %s256_s8, 128  ;;  %p499_p11 = scmp.lt.s32.totalorder %s256_s8, %s256_s8 }
  0x3a   :  { %373 = vmatpush3.bf16.msra.mxu0 %v372_v5  ;;  %v396_v15 = vpack.c.bf16 %v156_v11, %v155_v10  ;;  %v67_v16 = vld [vmem:[#allocation5 + $0x30] sm:$0xff]  ;;  %v68_v17 = vld [vmem:[#allocation5 + $0x38] sm:$0xff]  ;;  %v399_v18 = vpack.c.bf16 %v158_v13, %v157_v12  ;;  %v159_v19 = vld [vmem:[#allocation7 + $0x20] sm:$0xff]  ;;  %p495_p10 = scmp.ne.s32.totalorder %s256_s8, %s494_s9  ;;  %p500_p12 = scmp.lt.s32.totalorder %s494_s9, %s494_s9 }
  0x3b   :  { %374 = vmatprep.subr.bf16.mxu0 %v527_v0  ;;  %v160_v20 = vld [vmem:[#allocation7 + $0x28] sm:$0xff]  ;;  %v381_v21 = vpack.c.bf16 %v68_v17, %v67_v16  ;;  %v69_v22 = vld [vmem:[#allocation5 + $0x40] sm:$0xff]  ;;  %v161_v25 = vld [vmem:[#allocation7 + $0x30] sm:$0xff] }
  0x3c   :  { %397 = vmatpush3.bf16.msra.mxu1 %v396_v15  ;;  %v70_v23 = vld [vmem:[#allocation5 + $0x48] sm:$0xff]  ;;  %v402_v24 = vpack.c.bf16 %v160_v20, %v159_v19  ;;  %v162_v26 = vld [vmem:[#allocation7 + $0x38] sm:$0xff]  ;;  %v71_v28 = vld [vmem:[#allocation5 + $0x50] sm:$0xff]  ;;  %p501_p13 = por %p500_p12, %p499_p11 }
  0x3d   :  { %398 = vmatprep.subr.bf16.mxu1 %v527_v0  ;;  %v384_v27 = vpack.c.bf16 %v70_v23, %v69_v22  ;;  %v72_v29 = vld [vmem:[#allocation5 + $0x58] sm:$0xff]  ;;  %v405_v30 = vpack.c.bf16 %v162_v26, %v161_v25  ;;  %v163_v31 = vld [vmem:[#allocation7 + $0x40] sm:$0xff]  ;;  %v164_v32 = vld [vmem:[#allocation7 + $0x48] sm:$0xff] }
  0x3e   :  { %376 = vmatpush3.bf16.msra.mxu0 %v375_v7  ;;  %v387_v33 = vpack.c.bf16 %v72_v29, %v71_v28  ;;  %v73_v34 = vld [vmem:[#allocation5 + $0x60] sm:$0xff]  ;;  %v74_v35 = vld [vmem:[#allocation5 + $0x68] sm:$0xff]  ;;  %v408_v36 = vpack.c.bf16 %v164_v32, %v163_v31  ;;  %v165_v37 = vld [vmem:[#allocation7 + $0x50] sm:$0xff]  ;;  %p502_p0 = pnand %p501_p13, %p495_p10 }
  0x3f   :  { %377 = vmatprep.subr.bf16.mxu0 %v527_v0  ;;  %v166_v38 = vld [vmem:[#allocation7 + $0x58] sm:$0xff]  ;;  %v390_v39 = vpack.c.bf16 %v74_v35, %v73_v34  ;;  %v75_v40 = vld [vmem:[#allocation5 + $0x70] sm:$0xff]  ;;  %v167_v43 = vld [vmem:[#allocation7 + $0x60] sm:$0xff] }
  0x40   :  { %400 = vmatpush3.bf16.msra.mxu1 %v399_v18  ;;  %v76_v41 = vld [vmem:[#allocation5 + $0x78] sm:$0xff]  ;;  %v411_v42 = vpack.c.bf16 %v166_v38, %v165_v37  ;;  %v168_v44 = vld [vmem:[#allocation7 + $0x68] sm:$0xff]  ;;  %v169_v48 = vld [vmem:[#allocation7 + $0x70] sm:$0xff] }
  0x41   :  { %401 = vmatprep.subr.bf16.mxu1 %v527_v0  ;;  %v393_v45 = vpack.c.bf16 %v76_v41, %v75_v40  ;;  %v414_v46 = vpack.c.bf16 %v168_v44, %v167_v43  ;;  %v60_v47 = vld [vmem:[#allocation2] sm:$0xff] }
  0x42   :  { %379 = vmatpush3.bf16.msra.mxu0 %v378_v14  ;;  %v170_v49 = vld [vmem:[#allocation7 + $0x78] sm:$0xff] }
  0x43   :  { %380 = vmatprep.subr.bf16.mxu0 %v527_v0  ;;  %v417_v50 = vpack.c.bf16 %v170_v49, %v169_v48  ;;  %v265_v51 = vld [vmem:[%s639_s2] ss:$0 sm:$0xff] }
  0x44   :  { %403 = vmatpush3.bf16.msra.mxu1 %v402_v24  ;;  %v266_v56 = vld [vmem:[%s641_s4] ss:$0 sm:$0xff] }
  0x45   :  { %404 = vmatprep.subr.bf16.mxu1 %v527_v0 }
  0x46   :  { %382 = vmatpush3.bf16.msra.mxu0 %v381_v21 }
  0x47   :  { %383 = vmatprep.subr.bf16.mxu0 %v527_v0 }
  0x48   :  { %406 = vmatpush3.bf16.msra.mxu1 %v405_v30 }
  0x49   :  { %407 = vmatprep.subr.bf16.mxu1 %v527_v0 }
  0x4a   :  { %385 = vmatpush3.bf16.msra.mxu0 %v384_v27 }
  0x4b   :  { %386 = vmatprep.subr.bf16.mxu0 %v527_v0 }
  0x4c   :  { %409 = vmatpush3.bf16.msra.mxu1 %v408_v36 }
  0x4d   :  { %410 = vmatprep.subr.bf16.mxu1 %v527_v0 }
  0x4e   :  { %388 = vmatpush3.bf16.msra.mxu0 %v387_v33 }
  0x4f   :  { %389 = vmatprep.subr.bf16.mxu0 %v527_v0 }
  0x50   :  { %412 = vmatpush3.bf16.msra.mxu1 %v411_v42 }
  0x51   :  { %413 = vmatprep.subr.bf16.mxu1 %v527_v0 }
  0x52   :  { %391 = vmatpush3.bf16.msra.mxu0 %v390_v39 }
  0x53   :  { %392 = vmatprep.subr.bf16.mxu0 %v527_v0 }
  0x54   :  { %415 = vmatpush3.bf16.msra.mxu1 %v414_v46 }
  0x55   :  { %416 = vmatprep.subr.bf16.mxu1 %v527_v0 }
  0x56   :  { %394 = vmatpush3.bf16.msra.mxu0 %v393_v45 }
  0x58   :  { %418 = vmatpush3.bf16.msra.mxu1 %v417_v50 }
  0x59   :  { %334 = vmatmul.mubr.f32.vlgmr.msra.gmra.mrb[0].mxu0 %v60_v47 }
 0x12c   :  { %v150_v52 = vpop.f32.mrb[0].mxu0 }
 0x12d   :  { %v151_v53 = vadd.f32 %v265_v51, %v150_v52  ;;  %v335_v54 = vpop.f32.mrb[1].mxu0 }
 0x12f   :  { %v154_v55 = vmax.f32 %v151_v53, 0.0 }
 0x131   :  { %369 = vmatmul.mubr.f32.vlgmr.msra.gmra.mrb[0].mxu1 %v154_v55 }
 0x204   :  { %v244_v57 = vpop.f32.mrb[0].mxu1 }
 0x205   :  { %v245_v58 = vadd.f32 %v266_v56, %v244_v57  ;;  %v370_v59 = vpop.f32.mrb[1].mxu1 }
 0x207   :  { %248 = vst [vmem:[#allocation8] sm:$0xff] %v245_v58 }
 0x208   :  { %505 = shalt.err (!%p502_p0)
}
 0x209   :  { %s506_s11 = scalar_lea.hbm %s642_s5, 128 }
 0x20a   :  { %p507_p1 = scmp.ne.s32.totalorder %s642_s5, %s506_s11  ;;  %p510_p2 = scmp.lt.u32.totalorder %s506_s11, %s642_s5 }
 0x20c   :  { %p512_p3 = pnand %p510_p2, %p507_p1 }
 0x20e   :  { %515 = shalt.err (!%p512_p3)
}
 0x20f   :  { %258 = dma.vmem_to_hbm [thread:$0]  %s256_s8, 128, %s642_s5, [#allocation4]  }
 0x210   :  { %520 = dma.done.wait [#allocation4], 128  }
 0x211   :  { %521 = vsyncadd [#allocation4], 4294967168 }
 0x212   :  { %262 = vsyncpa [#allocation3], 1 }
 0x213   :  { %263 = vsyncpa [#allocation6], 1 }
 0x214   :  { %264 = vsyncpa [#allocation4], 1 }

</bundles_post_ra>
